<compile_context>
chip_gen: v5e
topology: v5e:2x2
jax: 0.10.0
libtpu: 0.0.40
codegen_flags: <defaults>
</compile_context>

<pallas_src>
import functools

import jax
import jax.numpy as jnp
from jax.experimental import pallas as pl
from jax.experimental.pallas import tpu as pltpu

MARGIN1 = 2.0
MARGIN2 = 1.0


def _quadruplet_loss_kernel(a_ref, p_ref, n1_ref, n2_ref, out_ref, *,
                            tile_rows, batch, margin1, margin2):
    i = pl.program_id(0)

    # Upcast after load so bf16 inputs keep f32 accumulation.
    a = a_ref[...].astype(jnp.float32)
    p = p_ref[...].astype(jnp.float32)
    n1 = n1_ref[...].astype(jnp.float32)
    n2 = n2_ref[...].astype(jnp.float32)

    # Hoist the five unique differences (the reference's neg5 == neg2).
    d_ap = a - p
    d_an1 = a - n1
    d_pn1 = p - n1
    d_pn2 = p - n2
    d_n12 = n1 - n2

    d_pos = jnp.sum(d_ap * d_ap, axis=1, keepdims=True)      # (TB, 1)
    d_neg = jnp.sum(d_an1 * d_an1, axis=1, keepdims=True)    # (TB, 1)
    d_neg2 = jnp.sum(d_n12 * d_n12, axis=1, keepdims=True)   # (TB, 1) == d_neg5
    d_neg3 = jnp.sum(d_pn1 * d_pn1, axis=1, keepdims=True)   # (TB, 1)
    d_neg4 = jnp.sum(d_pn2 * d_pn2, axis=1, keepdims=True)   # (TB, 1)

    relu = lambda x: jnp.maximum(x, 0.0)
    loss = (
        relu(margin1 + d_pos - d_neg)
        + relu(margin1 + d_pos - d_neg2)
        + relu(margin1 + d_pos - d_neg3)
        + relu(margin1 + d_pos - d_neg4)
        + relu(margin2 + d_pos - d_neg2)    # d_neg5 == d_neg2 (dedup'd)
    )  # (TB, 1)

    # Mask padded rows of the (possibly ragged) last tile.
    row = jax.lax.broadcasted_iota(jnp.int32, (tile_rows, 1), 0) + i * tile_rows
    loss = jnp.where(row < batch, loss, 0.0)

    # Per-tile partial sum, broadcast into a lane-dense (1, 8, 128) block so
    # each grid step writes its own independent output block ("parallel"-safe).
    partial = jnp.sum(loss)
    out_ref[...] = jnp.full(out_ref.shape, partial, dtype=jnp.float32)


def _choose_tile_rows(B, D, itemsize):
    # Keep 4 inputs x 2 pipeline buffers x TB x D x itemsize under ~24 MiB
    # (safe even on v7x's 64 MiB physical / 32 MiB default scoped VMEM).
    budget = 24 * 1024 * 1024
    cap = budget // (4 * 2 * D * itemsize)
    cap = max(8, (cap // 8) * 8)
    tb = min(512, cap)            # >=512 rows is where the HBM roofline plateaus
    if B <= tb:
        return B                  # single full-extent tile (any B allowed)
    return tb


def m_quadruplet_loss(anchor, positive, negative1, negative2,
                      margin1=MARGIN1, margin2=MARGIN2, tile_rows=None):
    B, D = anchor.shape
    itemsize = jnp.dtype(anchor.dtype).itemsize
    tb = tile_rows if tile_rows is not None else _choose_tile_rows(B, D, itemsize)
    num_tiles = pl.cdiv(B, tb)

    # Explicit VMEM budget: double-buffered inputs + small output + headroom.
    in_bytes = 4 * 2 * tb * D * itemsize
    vmem_limit = int(min(48 * 1024 * 1024,
                         max(16 * 1024 * 1024, in_bytes + (4 << 20))))

    kernel = functools.partial(
        _quadruplet_loss_kernel,
        tile_rows=tb, batch=B,
        margin1=float(margin1), margin2=float(margin2))

    in_spec = pl.BlockSpec((tb, D), lambda i: (i, 0))
    partials = pl.pallas_call(
        kernel,
        out_shape=jax.ShapeDtypeStruct((num_tiles, 8, 128), jnp.float32),
        grid=(num_tiles,),
        in_specs=[in_spec, in_spec, in_spec, in_spec],
        out_specs=pl.BlockSpec((1, 8, 128), lambda i: (i, 0, 0)),
        compiler_params=pltpu.CompilerParams(
            dimension_semantics=("parallel",),
            vmem_limit_bytes=vmem_limit,
        ),
    )(anchor, positive, negative1, negative2)

    # Final reduction over per-tile partial sums; divide by the TRUE batch size.
    return jnp.sum(partials[:, 0, 0]) / B


def _reference(anchor, positive, negative1, negative2,
               margin1=MARGIN1, margin2=MARGIN2):
    a, p, n1, n2 = (x.astype(jnp.float32)
                    for x in (anchor, positive, negative1, negative2))
    d_pos = jnp.sum((a - p) ** 2, axis=1)
    d_neg = jnp.sum((a - n1) ** 2, axis=1)
    d_neg2 = jnp.sum((n1 - n2) ** 2, axis=1)
    d_neg3 = jnp.sum((p - n1) ** 2, axis=1)
    d_neg4 = jnp.sum((p - n2) ** 2, axis=1)
    d_neg5 = jnp.sum((n1 - n2) ** 2, axis=1)
    relu = lambda x: jnp.maximum(x, 0.0)
    loss = (
        relu(margin1 + d_pos - d_neg)
        + relu(margin1 + d_pos - d_neg2)
        + relu(margin1 + d_pos - d_neg3)
        + relu(margin1 + d_pos - d_neg4)
        + relu(margin2 + d_pos - d_neg5)
    )
    return jnp.mean(loss)


if __name__ == "__main__":
    keys = jax.random.split(jax.random.PRNGKey(0), 8)

    # Case 1: small shapes matching the module's (B, D) embedding inputs.
    B, D = 8, 32
    anchor = jax.random.normal(keys[0], (B, D), dtype=jnp.float32)
    positive = jax.random.normal(keys[1], (B, D), dtype=jnp.float32)
    negative1 = jax.random.normal(keys[2], (B, D), dtype=jnp.float32)
    negative2 = jax.random.normal(keys[3], (B, D), dtype=jnp.float32)

    out = jax.block_until_ready(m_quadruplet_loss(anchor, positive, negative1, negative2))
    ref = _reference(anchor, positive, negative1, negative2)
    assert jnp.allclose(out, ref, rtol=1e-5, atol=1e-5), (out, ref)

    # Case 2: exercise the batch-tiled grid + ragged-last-tile masking
    # (B=20 with forced 8-row tiles -> 3 grid steps, last tile half-masked).
    B2, D2 = 20, 128
    a2 = jax.random.normal(keys[4], (B2, D2), dtype=jnp.float32)
    p2 = jax.random.normal(keys[5], (B2, D2), dtype=jnp.float32)
    n12 = jax.random.normal(keys[6], (B2, D2), dtype=jnp.float32)
    n22 = jax.random.normal(keys[7], (B2, D2), dtype=jnp.float32)

    out2 = jax.block_until_ready(m_quadruplet_loss(a2, p2, n12, n22, tile_rows=8))
    ref2 = _reference(a2, p2, n12, n22)
    assert jnp.allclose(out2, ref2, rtol=1e-5, atol=1e-5), (out2, ref2)

    print("KERNEL_OK")
</pallas_src>

<mosaic_0001>
module attributes {stable_mosaic.version = 11 : i64} {
  func.func @_quadruplet_loss_kernel(%arg0: i32, %arg1: memref<8x32xf32, #tpu.memory_space<vmem>>, %arg2: memref<8x32xf32, #tpu.memory_space<vmem>>, %arg3: memref<8x32xf32, #tpu.memory_space<vmem>>, %arg4: memref<8x32xf32, #tpu.memory_space<vmem>>, %arg5: memref<1x8x128xf32, #tpu.memory_space<vmem>>) attributes {dimension_semantics = [#tpu.dimension_semantics<parallel>], iteration_bounds = array<i64: 1>, scalar_prefetch = 0 : i64, scratch_operands = 0 : i64, tpu.core_type = #tpu.core_type<tc>, window_params = [{transform_indices = @transform_0, window_bounds = array<i64: 8, 32>}, {transform_indices = @transform_1, window_bounds = array<i64: 8, 32>}, {transform_indices = @transform_2, window_bounds = array<i64: 8, 32>}, {transform_indices = @transform_3, window_bounds = array<i64: 8, 32>}, {transform_indices = @transform_4, window_bounds = array<i64: 1, 8, 128>}]} {
    %c0 = arith.constant 0 : index
    %c0_0 = arith.constant 0 : index
    %0 = vector.load %arg1[%c0, %c0_0] : memref<8x32xf32, #tpu.memory_space<vmem>>, vector<8x32xf32>
    %c0_1 = arith.constant 0 : index
    %c0_2 = arith.constant 0 : index
    %1 = vector.load %arg2[%c0_1, %c0_2] : memref<8x32xf32, #tpu.memory_space<vmem>>, vector<8x32xf32>
    %c0_3 = arith.constant 0 : index
    %c0_4 = arith.constant 0 : index
    %2 = vector.load %arg3[%c0_3, %c0_4] : memref<8x32xf32, #tpu.memory_space<vmem>>, vector<8x32xf32>
    %c0_5 = arith.constant 0 : index
    %c0_6 = arith.constant 0 : index
    %3 = vector.load %arg4[%c0_5, %c0_6] : memref<8x32xf32, #tpu.memory_space<vmem>>, vector<8x32xf32>
    %4 = arith.subf %0, %1 : vector<8x32xf32>
    %5 = arith.subf %0, %2 : vector<8x32xf32>
    %6 = arith.subf %1, %2 : vector<8x32xf32>
    %7 = arith.subf %1, %3 : vector<8x32xf32>
    %8 = arith.subf %2, %3 : vector<8x32xf32>
    %9 = arith.mulf %4, %4 : vector<8x32xf32>
    %cst = arith.constant dense<0.000000e+00> : vector<8xf32>
    %10 = vector.multi_reduction <add>, %9, %cst [1] : vector<8x32xf32> to vector<8xf32>
    %11 = vector.shape_cast %10 : vector<8xf32> to vector<8x1xf32>
    %12 = arith.mulf %5, %5 : vector<8x32xf32>
    %cst_7 = arith.constant dense<0.000000e+00> : vector<8xf32>
    %13 = vector.multi_reduction <add>, %12, %cst_7 [1] : vector<8x32xf32> to vector<8xf32>
    %14 = vector.shape_cast %13 : vector<8xf32> to vector<8x1xf32>
    %15 = arith.mulf %8, %8 : vector<8x32xf32>
    %cst_8 = arith.constant dense<0.000000e+00> : vector<8xf32>
    %16 = vector.multi_reduction <add>, %15, %cst_8 [1] : vector<8x32xf32> to vector<8xf32>
    %17 = vector.shape_cast %16 : vector<8xf32> to vector<8x1xf32>
    %18 = arith.mulf %6, %6 : vector<8x32xf32>
    %cst_9 = arith.constant dense<0.000000e+00> : vector<8xf32>
    %19 = vector.multi_reduction <add>, %18, %cst_9 [1] : vector<8x32xf32> to vector<8xf32>
    %20 = vector.shape_cast %19 : vector<8xf32> to vector<8x1xf32>
    %21 = arith.mulf %7, %7 : vector<8x32xf32>
    %cst_10 = arith.constant dense<0.000000e+00> : vector<8xf32>
    %22 = vector.multi_reduction <add>, %21, %cst_10 [1] : vector<8x32xf32> to vector<8xf32>
    %23 = vector.shape_cast %22 : vector<8xf32> to vector<8x1xf32>
    %cst_11 = arith.constant 2.000000e+00 : f32
    %24 = vector.broadcast %cst_11 : f32 to vector<8x1xf32>
    %25 = arith.addf %24, %11 : vector<8x1xf32>
    %26 = arith.subf %25, %14 : vector<8x1xf32>
    %cst_12 = arith.constant 0.000000e+00 : f32
    %27 = vector.broadcast %cst_12 : f32 to vector<8x1xf32>
    %28 = arith.maximumf %26, %27 : vector<8x1xf32>
    %cst_13 = arith.constant 2.000000e+00 : f32
    %29 = vector.broadcast %cst_13 : f32 to vector<8x1xf32>
    %30 = arith.addf %29, %11 : vector<8x1xf32>
    %31 = arith.subf %30, %17 : vector<8x1xf32>
    %cst_14 = arith.constant 0.000000e+00 : f32
    %32 = vector.broadcast %cst_14 : f32 to vector<8x1xf32>
    %33 = arith.maximumf %31, %32 : vector<8x1xf32>
    %34 = arith.addf %28, %33 : vector<8x1xf32>
    %cst_15 = arith.constant 2.000000e+00 : f32
    %35 = vector.broadcast %cst_15 : f32 to vector<8x1xf32>
    %36 = arith.addf %35, %11 : vector<8x1xf32>
    %37 = arith.subf %36, %20 : vector<8x1xf32>
    %cst_16 = arith.constant 0.000000e+00 : f32
    %38 = vector.broadcast %cst_16 : f32 to vector<8x1xf32>
    %39 = arith.maximumf %37, %38 : vector<8x1xf32>
    %40 = arith.addf %34, %39 : vector<8x1xf32>
    %cst_17 = arith.constant 2.000000e+00 : f32
    %41 = vector.broadcast %cst_17 : f32 to vector<8x1xf32>
    %42 = arith.addf %41, %11 : vector<8x1xf32>
    %43 = arith.subf %42, %23 : vector<8x1xf32>
    %cst_18 = arith.constant 0.000000e+00 : f32
    %44 = vector.broadcast %cst_18 : f32 to vector<8x1xf32>
    %45 = arith.maximumf %43, %44 : vector<8x1xf32>
    %46 = arith.addf %40, %45 : vector<8x1xf32>
    %cst_19 = arith.constant 1.000000e+00 : f32
    %47 = vector.broadcast %cst_19 : f32 to vector<8x1xf32>
    %48 = arith.addf %47, %11 : vector<8x1xf32>
    %49 = arith.subf %48, %17 : vector<8x1xf32>
    %cst_20 = arith.constant 0.000000e+00 : f32
    %50 = vector.broadcast %cst_20 : f32 to vector<8x1xf32>
    %51 = arith.maximumf %49, %50 : vector<8x1xf32>
    %52 = arith.addf %46, %51 : vector<8x1xf32>
    %53 = tpu.iota {dimensions = array<i32: 0>} : vector<8x1xi32>
    %c8_i32 = arith.constant 8 : i32
    %54 = arith.muli %arg0, %c8_i32 : i32
    %55 = vector.broadcast %54 : i32 to vector<8x1xi32>
    %56 = arith.addi %53, %55 : vector<8x1xi32>
    %c8_i32_21 = arith.constant 8 : i32
    %57 = vector.broadcast %c8_i32_21 : i32 to vector<8x1xi32>
    %58 = arith.cmpi slt, %56, %57 : vector<8x1xi32>
    %cst_22 = arith.constant 0.000000e+00 : f32
    %59 = vector.broadcast %cst_22 : f32 to vector<8x1xf32>
    %60 = arith.select %58, %52, %59 : vector<8x1xi1>, vector<8x1xf32>
    %61 = vector.shape_cast %60 : vector<8x1xf32> to vector<1x8x1xf32>
    %cst_23 = arith.constant dense<0.000000e+00> : vector<1xf32>
    %62 = vector.multi_reduction <add>, %61, %cst_23 [1, 2] : vector<1x8x1xf32> to vector<1xf32>
    %63 = vector.shape_cast %62 : vector<1xf32> to vector<1x1x1xf32>
    %64 = vector.extract %63[0, 0, 0] : f32 from vector<1x1x1xf32>
    %65 = vector.broadcast %64 : f32 to vector<1x8x128xf32>
    %c0_24 = arith.constant 0 : index
    %c0_25 = arith.constant 0 : index
    %c0_26 = arith.constant 0 : index
    %66 = vector.load %arg5[%c0_24, %c0_25, %c0_26] : memref<1x8x128xf32, #tpu.memory_space<vmem>>, vector<1x8x128xf32>
    tpu.vector_store %arg5[%c0_24, %c0_25, %c0_26], %65 {strides = array<i32>} : memref<1x8x128xf32, #tpu.memory_space<vmem>>, vector<1x8x128xf32>,
    return
  }
  func.func @transform_0(%arg0: i32) -> (i32, i32) {
    %c0_i32 = arith.constant 0 : i32
    %c0_i32_0 = arith.constant 0 : i32
    return %arg0, %c0_i32 : i32, i32
  }
  func.func @transform_1(%arg0: i32) -> (i32, i32) {
    %c0_i32 = arith.constant 0 : i32
    %c0_i32_0 = arith.constant 0 : i32
    return %arg0, %c0_i32 : i32, i32
  }
  func.func @transform_2(%arg0: i32) -> (i32, i32) {
    %c0_i32 = arith.constant 0 : i32
    %c0_i32_0 = arith.constant 0 : i32
    return %arg0, %c0_i32 : i32, i32
  }
  func.func @transform_3(%arg0: i32) -> (i32, i32) {
    %c0_i32 = arith.constant 0 : i32
    %c0_i32_0 = arith.constant 0 : i32
    return %arg0, %c0_i32 : i32, i32
  }
  func.func @transform_4(%arg0: i32) -> (i32, i32, i32) {
    %c0_i32 = arith.constant 0 : i32
    %c0_i32_0 = arith.constant 0 : i32
    %c0_i32_1 = arith.constant 0 : i32
    return %arg0, %c0_i32, %c0_i32_0 : i32, i32, i32
  }
}

</mosaic_0001>

<bundles_post_ra>
// kernel: tpu_custom_call.1
= control target key start
LH: loop header
LB: loop body
LE: loop exit
PB: predicated region body
PF: predicated region fallthrough
CT: control target
= control target key end

     0   :  { %9 = vsyncpa [#allocation3], 0  ;;  %s343_s0 = inlined_call_operand.hbm [shape: f32[8,32], index: 0, kind: input, shape index: {}]   ;;  %s344_s1 = inlined_call_operand.hbm [shape: f32[8,32], index: 1, kind: input, shape index: {}]   ;;  %s345_s2 = inlined_call_operand.hbm [shape: f32[8,32], index: 2, kind: input, shape index: {}]   ;;  %s346_s3 = inlined_call_operand.hbm [shape: f32[8,32], index: 3, kind: input, shape index: {}]   ;;  %s347_s4 = inlined_call_operand.hbm [shape: f32[1,8,128], index: 4, kind: output, shape index: {}]  }
   0x1   :  { %10 = vsyncpa [#allocation6], 0 }
   0x2   :  { %11 = vsyncpa [#allocation9], 0  ;;  %s29_s17 = sshll.u32 %s344_s1, 4  ;;  %s30_s17 = int_to_ptr.hbm [resolvable:$true] %s29_s17 }
   0x3   :  { %12 = vsyncpa [#allocation4], 0  ;;  %s293_s18 = smov [#allocation5]   ;;  %s18_s22 = sshll.u32 %s343_s0, 4  ;;  %s19_s22 = int_to_ptr.hbm [resolvable:$true] %s18_s22 }
   0x4   :  { %s31_s19 = sshll.u32 %s293_s18, 4  ;;  %s294_s23 = smov [#allocation2]   ;;  %s32_s19 = int_to_ptr.vmem [resolvable:$true] %s31_s19 }
   0x5   :  { %34 = dma.hbm_to_vmem [thread:$0]  %s30_s17, 128, %s32_s19, [#allocation6]  }
   0x6   :  { %s20_s24 = sshll.u32 %s294_s23, 4  ;;  %s40_s27 = sshll.u32 %s345_s2, 4  ;;  %s21_s24 = int_to_ptr.vmem [resolvable:$true] %s20_s24  ;;  %s41_s27 = int_to_ptr.hbm [resolvable:$true] %s40_s27 }
   0x7   :  { %23 = dma.hbm_to_vmem [thread:$0]  %s19_s22, 128, %s21_s24, [#allocation3]  }
   0x8   :  { %s51_s29 = sshll.u32 %s346_s3, 4  ;;  %s295_s30 = smov [#allocation7]   ;;  %s52_s29 = int_to_ptr.hbm [resolvable:$true] %s51_s29 }
   0x9   :  { %s42_s5 = sshll.u32 %s295_s30, 4  ;;  %s296_s0 = smov [#allocation8]   ;;  %s43_s5 = int_to_ptr.vmem [resolvable:$true] %s42_s5 }
   0xa   :  { %45 = dma.hbm_to_vmem [thread:$0]  %s41_s27, 128, %s43_s5, [#allocation6]  }
   0xb   :  { %s53_s6 = sshll.u32 %s296_s0, 4  ;;  %s54_s6 = int_to_ptr.vmem [resolvable:$true] %s53_s6 }
   0xc   :  { %56 = dma.hbm_to_vmem [thread:$0]  %s52_s29, 128, %s54_s6, [#allocation9]  }
   0xd   :  { %285 = dma.done.wait [#allocation3], 128  }
   0xe   :  { %286 = vsyncadd [#allocation3], 4294967168 }
   0xf   :  { %287 = dma.done.wait [#allocation6], 256  }
  0x10   :  { %288 = vsyncadd [#allocation6], 4294967040 }
  0x11   :  { %289 = dma.done.wait [#allocation9], 128  }
  0x12   :  { %290 = vsyncadd [#allocation9], 4294967168  ;;  %v75_v0 = vld [vmem:[#allocation7] sm:$0xff]  ;;  %v76_v1 = vld [vmem:[#allocation8] sm:$0xff]  ;;  %vm83_vm0 = vcmask 261120   ;;  %vm126_vm1 = vcmask 7168  }
  0x13   :  { %v73_v2 = vld [vmem:[#allocation2] sm:$0xff]  ;;  %v81_v3 = vsub.f32 %v75_v0, %v76_v1  ;;  %v74_v4 = vld [vmem:[#allocation5] sm:$0xff]  ;;  %s297_s2 = smov [#allocation10]   ;;  %s146_s9 = sshll.u32 %s347_s4, 4  ;;  %s147_s9 = int_to_ptr.hbm [resolvable:$true] %s146_s9 }
  0x14   :  { %v77_v5 = vsub.f32 %v73_v2, %v74_v4  ;;  %v80_v6 = vsub.f32 %v74_v4, %v76_v1  ;;  %v79_v8 = vsub.f32 %v74_v4, %v75_v0  ;;  %v78_v11 = vsub.f32 %v73_v2, %v75_v0  ;;  %s144_s3 = sshll.u32 %s297_s2, 4  ;;  %s145_s3 = int_to_ptr.vmem [resolvable:$true] %s144_s3 }
  0x15   :  { %v91_v7 = vmul.f32 %v81_v3, %v81_v3 }
  0x16   :  { %v82_v9 = vmul.f32 %v77_v5, %v77_v5  ;;  %v99_v10 = vmul.f32 %v80_v6, %v80_v6  ;;  %v95_v15 = vmul.f32 %v79_v8, %v79_v8  ;;  %v87_v16 = vmul.f32 %v78_v11, %v78_v11 }
  0x17   :  { %v92_v12 = vsel %vm83_vm0, %v91_v7, 0.0 }
  0x18   :  { %93 = vadd.xlane.f32.xlu1 %v92_v12  ;;  %v84_v13 = vsel %vm83_vm0, %v82_v9, 0.0  ;;  %v100_v14 = vsel %vm83_vm0, %v99_v10, 0.0  ;;  %v96_v17 = vsel %vm83_vm0, %v95_v15, 0.0  ;;  %v88_v18 = vsel %vm83_vm0, %v87_v16, 0.0 }
  0x19   :  { %85 = vadd.xlane.f32.xlu0 %v84_v13  ;;  %101 = vadd.xlane.f32.xlu2 %v100_v14 }
  0x20   :  { %97 = vadd.xlane.f32.xlu1 %v96_v17 }
  0x21   :  { %89 = vadd.xlane.f32.xlu0 %v88_v18 }
  0x8b   :  { %v94_v19 = vpop.xlane.xlu1 %93 }
  0x8c   :  { %v86_v20 = vpop.xlane.xlu0 %85  ;;  %v102_v24 = vpop.xlane.xlu2 %101 }
  0x8d   :  { %v103_v21 = vadd.f32 2.0, %v86_v20  ;;  %v115_v26 = vadd.f32 1.0, %v86_v20 }
  0x8f   :  { %v106_v23 = vsub.f32 %v103_v21, %v94_v19  ;;  %v112_v29 = vsub.f32 %v103_v21, %v102_v24  ;;  %v116_v32 = vsub.f32 %v115_v26, %v94_v19 }
  0x91   :  { %v107_v30 = vmax.f32 %v106_v23, 0.0  ;;  %v113_v35 = vmax.f32 %v112_v29, 0.0  ;;  %v117_v37 = vmax.f32 %v116_v32, 0.0 }
  0x93   :  { %v98_v22 = vpop.xlane.xlu1 %97 }
  0x94   :  { %v90_v25 = vpop.xlane.xlu0 %89  ;;  %v109_v27 = vsub.f32 %v103_v21, %v98_v22 }
  0x95   :  { %v104_v28 = vsub.f32 %v103_v21, %v90_v25 }
  0x96   :  { %v110_v33 = vmax.f32 %v109_v27, 0.0 }
  0x97   :  { %v105_v31 = vmax.f32 %v104_v28, 0.0 }
  0x99   :  { %v108_v34 = vadd.f32 %v107_v30, %v105_v31 }
  0x9b   :  { %v111_v36 = vadd.f32 %v110_v33, %v108_v34 }
  0x9d   :  { %v114_v38 = vadd.f32 %v113_v35, %v111_v36 }
  0x9f   :  { %v118_v39 = vadd.f32 %v117_v37, %v114_v38 }
  0xa1   :  { %v127_v40 = vsel %vm126_vm1, %v118_v39, 0.0 }
  0xa2   :  { %128 = vadd.xlane.f32.xlu2 %v127_v40 }
 0x115   :  { %v129_v41 = vpop.xlane.xlu2 %128 }
 0x116   :  { %v130_v42 = vrot.slane %v129_v41, 4 }
 0x118   :  { %v131_v43 = vadd.f32 %v130_v42, %v129_v41 }
 0x11a   :  { %v132_v44 = vrot.slane %v131_v43, 2 }
 0x11c   :  { %v133_v45 = vadd.f32 %v132_v44, %v131_v43 }
 0x11e   :  { %v134_v46 = vrot.slane %v133_v45, 1 }
 0x120   :  { %v135_v47 = vadd.f32 %v134_v46, %v133_v45 }
 0x122   :  { %158 = vpush %v135_v47 }
 0x153   :  { %s159_s10 = spop %158 }
 0x154   :  { %v137_v48 = vstv %s159_s10 }
 0x155   :  { %138 = vst [vmem:[#allocation10] sm:$0xff] %v137_v48 }
 0x156   :  { %149 = dma.vmem_to_hbm [thread:$0]  %s145_s3, 128, %s147_s9, [#allocation4]  }
 0x157   :  { %291 = dma.done.wait [#allocation4], 128  }
 0x158   :  { %292 = vsyncadd [#allocation4], 4294967168 }
 0x159   :  { %154 = vsyncpa [#allocation3], 1 }
 0x15a   :  { %155 = vsyncpa [#allocation6], 1 }
 0x15b   :  { %156 = vsyncpa [#allocation9], 1 }
 0x15c   :  { %157 = vsyncpa [#allocation4], 1 }

</bundles_post_ra>
